<compile_context>
chip_gen: v7x
topology: tpu7x:2x2x1
jax: 0.10.0
libtpu: 0.0.40
codegen_flags: <defaults>
</compile_context>

<pallas_src>
import functools

import jax
import jax.numpy as jnp
from jax.experimental import pallas as pl
from jax.experimental.pallas import tpu as pltpu


def _pick_tile_p(C, HW, x_itemsize, t_itemsize, requested,
                 budget_bytes=12 << 20):
    """Largest multiple-of-128 lane tile (<= requested, <= HW) fitting budget.

    Budget is conservative for all generations (v5e scoped default 16 MiB,
    v6e/v7x 32 MiB); vmem_limit_bytes=32 MiB is passed for headroom.
    """
    if HW <= 128:
        return HW  # full extent: single tile, never ragged
    tp = min(int(requested), HW)
    tp = max(128, (tp // 128) * 128)

    def footprint(t):
        # double-buffered input DMA tiles + ~4 live (C, t) f32 temporaries
        # (upcast x, exp, select path, slack) + a handful of (1, t) f32 rows.
        dma = 2 * t * (C * x_itemsize + t_itemsize)
        work = 4 * (C * 4 * t) + 12 * 4 * t
        return dma + work

    while tp > 128 and footprint(tp) > budget_bytes:
        tp = max(128, ((tp // 2) // 128) * 128)
    return tp


def _focal_loss_kernel(x_ref, t_ref, o_ref, *, alpha, gamma, ignore_index,
                       hw, tile_p, ragged):
    x = x_ref[...].astype(jnp.float32)                 # (C, TP) f32 (in-kernel upcast)
    t = t_ref[...].astype(jnp.int32)                   # (1, TP) int32 (native-dtype DMA)
    C = x.shape[0]

    if ragged:
        # Only emitted when HW % tile_p != 0: mask the tail tile's garbage lanes.
        i = pl.program_id(1)
        lane = jax.lax.broadcasted_iota(jnp.int32, t.shape, 1)   # (1, TP)
        lane_valid = (i * tile_p + lane) < hw
        t = jnp.where(lane_valid, t, ignore_index)
        # Clamp x BEFORE exp/logsumexp so garbage can't generate inf/NaN that
        # would survive the later `* valid` (inf * 0 = NaN).
        x = jnp.where(lane_valid, x, 0.0)

    # Stable log-sum-exp over the class (sublane) axis.
    m = jnp.max(x, axis=0, keepdims=True)                        # (1, TP)
    e = jnp.exp(x - m)                                           # (C, TP)
    s = jnp.sum(e, axis=0, keepdims=True)                        # (1, TP)

    # Target-class logit: (C,1) iota broadcast against (1,TP) targets,
    # select-then-sum (no f32 onehot, no extra multiply).
    cls = jax.lax.broadcasted_iota(jnp.int32, (C, 1), 0)         # (C, 1)
    logit_t = jnp.sum(jnp.where(cls == t, x, 0.0),
                      axis=0, keepdims=True)                     # (1, TP)

    valid = (t != ignore_index).astype(jnp.float32)              # (1, TP)
    # ce = logsumexp(x) - x[target]; exactly 0 at ignored / padded pixels.
    ce = (jnp.log(s) + m - logit_t) * valid                      # (1, TP)

    if gamma == 0.0:
        focal = alpha * ce
    else:
        pt = jnp.exp(-ce)                       # exact, (1, TP) row only
        omega = jnp.maximum(1.0 - pt, 0.0)      # clamp: no NaN from fp rounding
        g_int = int(gamma)
        if float(g_int) == float(gamma) and 0 < g_int <= 4:
            w = omega
            for _ in range(g_int - 1):
                w = w * omega
        else:
            w = omega ** gamma
        focal = alpha * w * ce

    # Per-tile partial sum (both grid axes "parallel" -> megacore-friendly).
    o_ref[...] = jnp.sum(focal).reshape(1, 1)


def focal_loss(inputs, targets, *, alpha=1.0, gamma=0.0, size_average=True,
               ignore_index=255, tile_p=8192):
    """inputs: (N, C, H, W) float (any float dtype); targets: (N, H, W) int.

    Returns a scalar f32 matching the PyTorch FocalLoss forward.
    """
    N, C, H, W = inputs.shape
    HW = H * W
    P = N * HW

    # Layout glue only (free contiguous reshapes; no transpose, no pad, no cast).
    x = inputs.reshape(N, C, HW)
    t = targets.reshape(N, 1, HW)
    if not jnp.issubdtype(t.dtype, jnp.integer):
        t = t.astype(jnp.int32)   # only for pathological float targets

    tp = _pick_tile_p(C, HW, jnp.dtype(x.dtype).itemsize,
                      jnp.dtype(t.dtype).itemsize, tile_p)
    num_tiles = pl.cdiv(HW, tp)
    ragged = (HW % tp) != 0

    kernel = functools.partial(
        _focal_loss_kernel,
        alpha=float(alpha), gamma=float(gamma),
        ignore_index=int(ignore_index),
        hw=HW, tile_p=tp, ragged=ragged)

    partials = pl.pallas_call(
        kernel,
        out_shape=jax.ShapeDtypeStruct((N, num_tiles, 1, 1), jnp.float32),
        grid_spec=pltpu.PrefetchScalarGridSpec(
            num_scalar_prefetch=0,
            grid=(N, num_tiles),
            in_specs=[
                pl.BlockSpec((None, C, tp), lambda n, i: (n, 0, i)),
                pl.BlockSpec((None, 1, tp), lambda n, i: (n, 0, i)),
            ],
            out_specs=pl.BlockSpec((None, None, 1, 1),
                                   lambda n, i: (n, i, 0, 0)),
        ),
        compiler_params=pltpu.CompilerParams(
            dimension_semantics=("parallel", "parallel"),
            vmem_limit_bytes=32 << 20),
    )(x, t)

    total = jnp.sum(partials)
    if size_average:
        total = total / jnp.float32(P)
    return total


def _ref_focal_loss(inputs, targets, *, alpha=1.0, gamma=0.0,
                    size_average=True, ignore_index=255):
    """Pure-JAX reference mirroring the PyTorch module."""
    x = inputs.astype(jnp.float32)
    logp = jax.nn.log_softmax(x, axis=1)                         # (N, C, H, W)
    t = targets.astype(jnp.int32)
    valid = t != ignore_index
    t_safe = jnp.where(valid, t, 0)
    gathered = jnp.take_along_axis(logp, t_safe[:, None], axis=1)[:, 0]
    ce = jnp.where(valid, -gathered, 0.0)
    pt = jnp.exp(-ce)
    fl = alpha * (1.0 - pt) ** gamma * ce
    return fl.mean() if size_average else fl.sum()


if __name__ == "__main__":
    key = jax.random.PRNGKey(0)
    k1, k2, k3, k4 = jax.random.split(key, 4)

    # ---- Case 1: HW divisible by the tile (no masking path emitted) --------
    N, C, H, W = 2, 4, 16, 16
    inputs = jax.random.normal(k1, (N, C, H, W), dtype=jnp.float32)
    targets = jax.random.randint(k2, (N, H, W), 0, C, dtype=jnp.int32)
    targets = targets.at[0, 0, :4].set(255)      # sprinkle ignore_index pixels
    targets = targets.at[1, 3, 5:9].set(255)

    out0 = jax.block_until_ready(
        focal_loss(inputs, targets, alpha=1.0, gamma=0.0, size_average=True,
                   ignore_index=255))
    ref0 = _ref_focal_loss(inputs, targets, alpha=1.0, gamma=0.0,
                           size_average=True, ignore_index=255)
    assert jnp.allclose(out0, ref0, atol=1e-5, rtol=1e-4), (out0, ref0)

    out2 = jax.block_until_ready(
        focal_loss(inputs, targets, alpha=0.5, gamma=2.0, size_average=True,
                   ignore_index=255))
    ref2 = _ref_focal_loss(inputs, targets, alpha=0.5, gamma=2.0,
                           size_average=True, ignore_index=255)
    assert jnp.allclose(out2, ref2, atol=1e-4, rtol=1e-4), (out2, ref2)

    # bf16 logits: native-dtype DMA, in-kernel f32 upcast
    out_bf = jax.block_until_ready(
        focal_loss(inputs.astype(jnp.bfloat16), targets, alpha=1.0, gamma=0.0,
                   size_average=True, ignore_index=255))
    ref_bf = _ref_focal_loss(inputs.astype(jnp.bfloat16), targets, alpha=1.0,
                             gamma=0.0, size_average=True, ignore_index=255)
    assert jnp.allclose(out_bf, ref_bf, atol=5e-3, rtol=5e-3), (out_bf, ref_bf)

    # ---- Case 2: ragged tail tile (HW % tile != 0) + multi-tile partials ---
    N2, C2, H2, W2 = 2, 5, 18, 18                # HW = 324, tile_p -> 256
    inputs2 = jax.random.normal(k3, (N2, C2, H2, W2), dtype=jnp.float32)
    targets2 = jax.random.randint(k4, (N2, H2, W2), 0, C2, dtype=jnp.int32)
    targets2 = targets2.at[0, :2, :].set(255)

    out_r = jax.block_until_ready(
        focal_loss(inputs2, targets2, alpha=1.0, gamma=2.0, size_average=True,
                   ignore_index=255, tile_p=256))
    ref_r = _ref_focal_loss(inputs2, targets2, alpha=1.0, gamma=2.0,
                            size_average=True, ignore_index=255)
    assert jnp.allclose(out_r, ref_r, atol=1e-4, rtol=1e-4), (out_r, ref_r)

    # size_average=False (sum reduction)
    out_s = jax.block_until_ready(
        focal_loss(inputs2, targets2, alpha=1.0, gamma=0.0, size_average=False,
                   ignore_index=255, tile_p=256))
    ref_s = _ref_focal_loss(inputs2, targets2, alpha=1.0, gamma=0.0,
                            size_average=False, ignore_index=255)
    assert jnp.allclose(out_s, ref_s, atol=1e-3, rtol=1e-4), (out_s, ref_s)

    print("KERNEL_OK")
</pallas_src>

<mosaic_0001>
module attributes {stable_mosaic.version = 11 : i64} {
  func.func @_focal_loss_kernel(%arg0: i32, %arg1: i32, %arg2: memref<1x4x256xf32, #tpu.memory_space<vmem>>, %arg3: memref<1x1x256xi32, #tpu.memory_space<vmem>>, %arg4: memref<1x1x1x1xf32, #tpu.memory_space<vmem>>) attributes {dimension_semantics = [#tpu.dimension_semantics<parallel>, #tpu.dimension_semantics<parallel>], iteration_bounds = array<i64: 2, 1>, scalar_prefetch = 0 : i64, scratch_operands = 0 : i64, tpu.core_type = #tpu.core_type<tc>, window_params = [{transform_indices = @transform_0, window_bounds = array<i64: 1, 4, 256>}, {transform_indices = @transform_1, window_bounds = array<i64: 1, 1, 256>}, {transform_indices = @transform_2, window_bounds = array<i64: 1, 1, 1, 1>}]} {
    %c0 = arith.constant 0 : index
    %c0_0 = arith.constant 0 : index
    %c0_1 = arith.constant 0 : index
    %0 = vector.load %arg2[%c0, %c0_0, %c0_1] : memref<1x4x256xf32, #tpu.memory_space<vmem>>, vector<1x4x256xf32>
    %1 = vector.shape_cast %0 : vector<1x4x256xf32> to vector<4x256xf32>
    %c0_2 = arith.constant 0 : index
    %c0_3 = arith.constant 0 : index
    %c0_4 = arith.constant 0 : index
    %2 = vector.load %arg3[%c0_2, %c0_3, %c0_4] : memref<1x1x256xi32, #tpu.memory_space<vmem>>, vector<1x1x256xi32>
    %3 = vector.shape_cast %2 : vector<1x1x256xi32> to vector<1x256xi32>
    %cst = arith.constant dense<0xFF800000> : vector<256xf32>
    %4 = vector.multi_reduction <maximumf>, %1, %cst [0] : vector<4x256xf32> to vector<256xf32>
    %5 = vector.shape_cast %4 : vector<256xf32> to vector<1x256xf32>
    %6 = vector.broadcast %5 : vector<1x256xf32> to vector<4x256xf32>
    %7 = arith.subf %1, %6 : vector<4x256xf32>
    %8 = math.exp %7 : vector<4x256xf32>
    %cst_5 = arith.constant dense<0.000000e+00> : vector<256xf32>
    %9 = vector.multi_reduction <add>, %8, %cst_5 [0] : vector<4x256xf32> to vector<256xf32>
    %10 = vector.shape_cast %9 : vector<256xf32> to vector<1x256xf32>
    %11 = tpu.iota {dimensions = array<i32: 0>} : vector<4x1xi32>
    %12 = vector.broadcast %11 : vector<4x1xi32> to vector<4x256xi32>
    %13 = vector.broadcast %3 : vector<1x256xi32> to vector<4x256xi32>
    %14 = arith.cmpi eq, %12, %13 : vector<4x256xi32>
    %cst_6 = arith.constant 0.000000e+00 : f32
    %15 = vector.broadcast %cst_6 : f32 to vector<4x256xf32>
    %16 = arith.select %14, %1, %15 : vector<4x256xi1>, vector<4x256xf32>
    %cst_7 = arith.constant dense<0.000000e+00> : vector<256xf32>
    %17 = vector.multi_reduction <add>, %16, %cst_7 [0] : vector<4x256xf32> to vector<256xf32>
    %18 = vector.shape_cast %17 : vector<256xf32> to vector<1x256xf32>
    %c255_i32 = arith.constant 255 : i32
    %19 = vector.broadcast %c255_i32 : i32 to vector<1x256xi32>
    %20 = arith.cmpi ne, %3, %19 : vector<1x256xi32>
    %21 = arith.extui %20 : vector<1x256xi1> to vector<1x256xi32>
    %22 = arith.sitofp %21 : vector<1x256xi32> to vector<1x256xf32>
    %23 = math.log %10 : vector<1x256xf32>
    %24 = arith.addf %23, %5 : vector<1x256xf32>
    %25 = arith.subf %24, %18 : vector<1x256xf32>
    %26 = arith.mulf %25, %22 : vector<1x256xf32>
    %cst_8 = arith.constant 1.000000e+00 : f32
    %27 = vector.broadcast %cst_8 : f32 to vector<1x256xf32>
    %28 = arith.mulf %27, %26 : vector<1x256xf32>
    %29 = vector.shape_cast %28 : vector<1x256xf32> to vector<1x1x256xf32>
    %cst_9 = arith.constant dense<0.000000e+00> : vector<1xf32>
    %30 = vector.multi_reduction <add>, %29, %cst_9 [1, 2] : vector<1x1x256xf32> to vector<1xf32>
    %31 = vector.shape_cast %30 : vector<1xf32> to vector<1x1x1xf32>
    %32 = vector.extract %31[0, 0, 0] : f32 from vector<1x1x1xf32>
    %33 = vector.broadcast %32 : f32 to vector<1x1xf32>
    %c0_10 = arith.constant 0 : index
    %c0_11 = arith.constant 0 : index
    %c0_12 = arith.constant 0 : index
    %c0_13 = arith.constant 0 : index
    %34 = vector.load %arg4[%c0_10, %c0_11, %c0_12, %c0_13] : memref<1x1x1x1xf32, #tpu.memory_space<vmem>>, vector<1x1x1x1xf32>
    %35 = vector.shape_cast %34 : vector<1x1x1x1xf32> to vector<1x1xf32>
    %36 = vector.shape_cast %33 : vector<1x1xf32> to vector<1x1x1x1xf32>
    tpu.vector_store %arg4[%c0_10, %c0_11, %c0_12, %c0_13], %36 {strides = array<i32>} : memref<1x1x1x1xf32, #tpu.memory_space<vmem>>, vector<1x1x1x1xf32>,
    return
  }
  func.func @transform_0(%arg0: i32, %arg1: i32) -> (i32, i32, i32) {
    %c0_i32 = arith.constant 0 : i32
    %c0_i32_0 = arith.constant 0 : i32
    return %arg0, %c0_i32, %arg1 : i32, i32, i32
  }
  func.func @transform_1(%arg0: i32, %arg1: i32) -> (i32, i32, i32) {
    %c0_i32 = arith.constant 0 : i32
    %c0_i32_0 = arith.constant 0 : i32
    return %arg0, %c0_i32, %arg1 : i32, i32, i32
  }
  func.func @transform_2(%arg0: i32, %arg1: i32) -> (i32, i32, i32, i32) {
    %c0_i32 = arith.constant 0 : i32
    %c0_i32_0 = arith.constant 0 : i32
    %c0_i32_1 = arith.constant 0 : i32
    return %arg0, %arg1, %c0_i32, %c0_i32_0 : i32, i32, i32, i32
  }
}

</mosaic_0001>

<bundles_post_ra>
// kernel: tpu_custom_call.1
= control target key start
LH: loop header
LB: loop body
LE: loop exit
PB: predicated region body
PF: predicated region fallthrough
CT: control target
= control target key end

     0   :  { %7 = vsyncpa [#allocation3], 0  ;;  %s838_s0 = inlined_call_operand.hbm [shape: f32[2,4,256], index: 0, kind: input, shape index: {}]   ;;  %s839_s1 = inlined_call_operand.hbm [shape: s32[2,1,256], index: 1, kind: input, shape index: {}]   ;;  %s840_s2 = inlined_call_operand.vmem [shape: f32[2,1,1,1], index: 2, kind: output, shape index: {}]  }
   0x1   :  { %9 = vsyncpa [#allocation3 + $0x1], 0 }
   0x2   :  { %10 = vsyncpa [#allocation5], 0 }
   0x3   :  { %12 = vsyncpa [#allocation5 + $0x1], 0  ;;  %s666_s9 = smov 0   ;;  %s668_s10 = smov 0  }
   0x4   :  { %s670_s11 = smov 0   ;;  %s672_s12 = smov 0  }
   0x5   :  { %s674_s13 = smov 0   ;;  %s676_s14 = smov 0  }
   0x6 LB: > { %s444_s15 = sadd.s32 4294967295, %s646_s14   ;;  %s30_s16 = sadd.s32 1, %s642_s13  ;;  %s646_s14 = sphi %s676_s14, %s18_s14   ;;  %s642_s13 = sphi %s674_s13, %s854_s13   ;;  %s638_s12 = sphi %s672_s12, %s853_s12   ;;  %s634_s11 = sphi %s670_s11, %s852_s11   ;;  %s630_s10 = sphi %s668_s10, %s851_s10   ;;  %s626_s9 = sphi %s666_s9, %s850_s9  }
   0x7   : > { %p32_p0 = scmp.ge.s32.totalorder %s30_s16, 2  ;;  %s39_s17 = sadd.s32 1, %s634_s11 }
   0x8   : > { %p46_p1 = scmp.ne.s32.totalorder %s634_s11, %s630_s10  ;;  %p47_p2 = scmp.eq.s32.totalorder %s646_s14, 0 }
   0x9   : > { %s856_s16 = smov (%p32_p0, %s30_s16), 0  ;;  %p52_p4 = scmp.ne.s32.totalorder %s630_s10, %s626_s9 }
   0xa   : > { %p702_p3 = por %p47_p2, %p46_p1  ;;  %s34_s19 = ssub.s32 %s642_s13, %s856_s16 }
   0xb   : > { %p53_p5 = scmp.eq.s32.totalorder %s444_s15, 0  ;;  %p37_p6 = scmp.eq.s32.totalorder %s34_s19, 0 }
   0xc   : > { %p475_p8 = scmp.lt.s32.totalorder %s646_s14, 2  ;;  %s718_s22 = sand.u32 1, %s634_s11  }
   0xd   : > { %p709_p7 = por %p53_p5, %p52_p4  ;;  %s460_s23 = sshll.u32 %s642_s13, 7 }
   0xe   : > { %s715_s21 = scalar_select %p37_p6, %s634_s11, %s39_s17  }
   0xf   : > { %s843_s20 = scalar_select %p709_p7, 1, 0 }
  0x10   : > { %s448_s24 = sshll.u32 %s718_s22, 3  ;;  %s725_s27 = scalar_lea.hbm %s838_s0, %s460_s23 }
  0x11   : > { %s136_s28 = scalar_lea.vmem [#allocation2], %s448_s24  ;;  %p729_p9 = pnand %p475_p8, %p702_p3 }
  0x12   : > { %s146_s29 = sshll.u32 %s136_s28, 4  ;;  %s133_s3 = scalar_lea.sflag [#allocation3], %s718_s22  ;;  %s733_s29 = int_to_ptr.vmem [resolvable:$true] %s146_s29 }
  0x13   : > { %s532_s4 = scalar_lea.hbm %s725_s27, 128  ;;  %p534_p13 = pneg %p729_p9 }
  0x14   : > { %p533_p12 = scmp.ne.s32.totalorder %s725_s27, %s532_s4  ;;  %s537_s7 = scalar_lea.hbm %s838_s0, 256 }
  0x15   : > { %p538_p2 = scmp.lt.u32.totalorder %s725_s27, %s838_s0  ;;  %p539_p3 = scmp.lt.u32.totalorder %s537_s7, %s532_s4 }
  0x16   : > { %p535_p0 = pnand %p534_p13, %p533_p12  ;;  %p541_p5 = scmp.lt.u32.totalorder %s532_s4, %s725_s27 }
  0x17   : > { %p540_p4 = por %p539_p3, %p538_p2 }
  0x18   : > { %p536_p1 = pneg %p535_p0 }
  0x19   : > { %p542_p6 = por %p541_p5, %p540_p4 }
  0x1b   : > { %p543_p8 = pnand %p542_p6, %p536_p1 }
  0x1d   : > { %546 = shalt.err (!%p543_p8)
}
  0x1e   : > { %s547_s15 = scalar_lea.vmem %s733_s29, 128  ;;  %s648_s17 = smov [#allocation2]  }
  0x1f   : > { %p548_p12 = scmp.ne.s32.totalorder %s733_s29, %s547_s15  ;;  %s552_s18 = sshll.u32 %s648_s17, 4  ;;  %s553_s18 = int_to_ptr.vmem [resolvable:$false] %s552_s18 }
  0x20   : > { %s554_s19 = scalar_lea.vmem %s553_s18, 256  ;;  %p555_p11 = scmp.lt.s32.totalorder %s733_s29, %s553_s18 }
  0x21   : > { %p550_p0 = pnand %p548_p12, %p534_p13  ;;  %p556_p2 = scmp.lt.s32.totalorder %s554_s19, %s547_s15 }
  0x23   : > { %p551_p10 = pneg %p550_p0  ;;  %p557_p3 = por %p556_p2, %p555_p11 }
  0x25   : > { %p558_p4 = pnand %p557_p3, %p551_p10 }
  0x27   : > { %561 = shalt.err (!%p558_p4)
}
  0x28   : > { %471 = dma.hbm_to_vmem [thread:$0]  (!%p729_p9), %s725_s27, 128, %s733_s29, %s133_s3  }
  0x29   : > { %p845_p1 = scmp.lt.s32.totalorder %s646_s14, 3  ;;  %p846_p5 = scmp.ge.s32.totalorder %s646_s14, 1 }
  0x2a   : > { %s451_s24 = sshll.u32 %s718_s22, 1  ;;  %s461_s25 = sshll.u32 %s642_s13, 5 }
  0x2b   : > { %p767_p6 = pnand %p846_p5, %p845_p1  ;;  %s776_s4 = scalar_lea.hbm %s839_s1, %s461_s25 }
  0x2c   : > { %s157_s5 = scalar_lea.vmem [#allocation4], %s451_s24  ;;  %s154_s27 = scalar_lea.sflag [#allocation5], %s718_s22 }
  0x2d   : > { %s847_s23 = scalar_select %p767_p6, 1, 0 }
  0x2e   : > { %s167_s6 = sshll.u32 %s157_s5, 4  ;;  %s562_s29 = scalar_lea.hbm %s776_s4, 32  ;;  %s168_s6 = int_to_ptr.vmem [resolvable:$true] %s167_s6 }
  0x2f   : > { %p563_p10 = scmp.ne.s32.totalorder %s776_s4, %s562_s29  ;;  %s567_s8 = scalar_lea.hbm %s839_s1, 64 }
  0x30   : > { %p568_p12 = scmp.lt.u32.totalorder %s776_s4, %s839_s1  ;;  %p569_p0 = scmp.lt.u32.totalorder %s567_s8, %s562_s29 }
  0x31   : > { %p565_p11 = pnand %p563_p10, %p534_p13  ;;  %p571_p3 = scmp.lt.u32.totalorder %s562_s29, %s776_s4 }
  0x32   : > { %p570_p2 = por %p569_p0, %p568_p12 }
  0x33   : > { %p566_p8 = pneg %p565_p11 }
  0x34   : > { %p572_p4 = por %p571_p3, %p570_p2 }
  0x36   : > { %p573_p1 = pnand %p572_p4, %p566_p8 }
  0x38   : > { %576 = shalt.err (!%p573_p1)
}
  0x39   : > { %s577_s22 = scalar_lea.vmem %s168_s6, 32  ;;  %s649_s17 = smov [#allocation4]  }
  0x3a   : > { %p578_p5 = scmp.ne.s32.totalorder %s168_s6, %s577_s22  ;;  %s582_s18 = sshll.u32 %s649_s17, 4  ;;  %s583_s18 = int_to_ptr.vmem [resolvable:$false] %s582_s18 }
  0x3b   : > { %s584_s19 = scalar_lea.vmem %s583_s18, 64  ;;  %p585_p7 = scmp.lt.s32.totalorder %s168_s6, %s583_s18 }
  0x3c   : > { %p580_p10 = pnand %p578_p5, %p534_p13  ;;  %p586_p6 = scmp.lt.s32.totalorder %s584_s19, %s577_s22 }
  0x3e   : > { %p581_p11 = pneg %p580_p10  ;;  %p587_p0 = por %p586_p6, %p585_p7 }
  0x40   : > { %p588_p12 = pnand %p587_p0, %p581_p11 }
  0x42   : > { %591 = shalt.err (!%p588_p12)
}
  0x43   : > { %474 = dma.hbm_to_vmem [thread:$0]  (!%p729_p9), %s776_s4, 32, %s168_s6, %s154_s27  }
  0x44   : > { %p848_p8 = scmp.ne.s32.totalorder %s847_s23, 0 }
  0x45   : > { %s178_s24 = sand.u32 (!%p848_p8), 1, %s630_s10   ;;  %p849_p13 = scmp.ne.s32.totalorder (!%p848_p8), %s843_s20, 0 }
  0x46   : > { %176 = sbr.rel (%p848_p8) target bundleno = 357 (0x165), region = 28  ;;  %s455_s25 = sshll.u32 (!%p848_p8), %s178_s24, 3 }
  0x47   : > { %s179_s26 = scalar_lea.sflag (!%p848_p8), [#allocation3], %s178_s24  ;;  %s182_s28 = scalar_lea.vmem (!%p848_p8), [#allocation2], %s455_s25 }
  0x4d   : > { %617 = dma.done.wait (%p849_p13), %s179_s26, 128  }
  0x4e   : > { %619 = vsyncadd (%p849_p13), %s179_s26, 4294967168  ;;  %s456_s5 = sshll.u32 %s178_s24, 1  ;;  %s188_s29 = scalar_lea.sflag [#allocation5], %s178_s24 }
  0x4f   : > { %s191_s30 = scalar_lea.vmem [#allocation4], %s456_s5 }
  0x50   : > { %621 = dma.done.wait (%p849_p13), %s188_s29, 32  }
  0x51   : > { %623 = vsyncadd (%p849_p13), %s188_s29, 4294967264  ;;  %vm231_vm0 = vcmask 1043456   ;;  %v226_v0 = vld [vmem:[%s182_s28] sm:$0xff]  ;;  %v270_v15 = vlaneseq  ;;  %v227_v22 = vld [vmem:[%s191_s30] sm:$0x3]  ;;  %v650_v57 = vmov 0.0  }
  0x52   : > { %v229_v1 = vcombine.high %v226_v0, %v226_v0  ;;  %v232_v2 = vsel %vm231_vm0, %v226_v0, -inf  ;;  %vm298_vm3 = vcmp.ne.s32.totalorder %v227_v22, 255  ;;  %vm322_vm4 = vcmask 1040384   ;;  %p220_p7 = scmp.lt.s32.totalorder %s638_s12, 1 }
  0x53   : > { %v233_v3 = vrot.slane %v232_v2, 4  ;;  %v271_v18 = vshrl.u32 %v270_v15, 7  ;;  %v457_v58 = vsel %vm298_vm3, 1.0, %v650_v57  ;;  %vm336_vm5 = vcmask 0  }
  0x54   : > { %v239_v4 = vsel %vm231_vm0, %v229_v1, -inf  ;;  %s858_s12 = smov (!%p220_p7, %s638_s12), 1 }
  0x55   : > { %v234_v5 = vmax.f32 %v232_v2, %v233_v3  ;;  %v240_v6 = vrot.slane %v239_v4, 4  ;;  %v274_v21 = vsub.s32 0, %v271_v18  ;;  %v278_v23 = vsub.s32 1, %v271_v18  ;;  %s225_s4 = scalar_lea.vmem %s840_s2, %s858_s12 }
  0x57   : > { %v235_v7 = vrot.slane %v234_v5, 2  ;;  %v241_v8 = vmax.f32 %v239_v4, %v240_v6  ;;  %v275_v24 = vrot.slane %v227_v22, %v274_v21  ;;  %v279_v25 = vrot.slane %v227_v22, %v278_v23 }
  0x58   : > { %v317_v4 = vrot.slane %v457_v58, %v278_v23 }
  0x59   : > { %v236_v9 = vmax.f32 %v234_v5, %v235_v7  ;;  %v242_v10 = vrot.slane %v241_v8, 2  ;;  %vm280_vm1 = vcmp.eq.s32.totalorder %v271_v18, %v275_v24  ;;  %vm281_vm2 = vcmp.eq.s32.totalorder %v271_v18, %v279_v25 }
  0x5a   : > { %v282_v26 = vsel %vm280_vm1, %v226_v0, 0.0  ;;  %v283_v30 = vsel %vm281_vm2, %v229_v1, 0.0  ;;  %v313_v1 = vrot.slane %v457_v58, %v274_v21 }
  0x5b   : > { %v237_v11 = vrot.slane %v236_v9, 1  ;;  %v243_v12 = vmax.f32 %v241_v8, %v242_v10  ;;  %v284_v32 = vsel %vm231_vm0, %v282_v26, 0.0  ;;  %v291_v36 = vsel %vm231_vm0, %v283_v30, 0.0 }
  0x5c   : > { %v285_v37 = vrot.slane %v284_v32, 4  ;;  %v292_v40 = vrot.slane %v291_v36, 4 }
  0x5d   : > { %v238_v13 = vmax.f32 %v236_v9, %v237_v11  ;;  %v244_v14 = vrot.slane %v243_v12, 1 }
  0x5e   : > { %v286_v43 = vadd.f32 %v285_v37, %v284_v32  ;;  %v293_v46 = vadd.f32 %v292_v40, %v291_v36 }
  0x5f   : > { %v245_v16 = vmax.f32 %v243_v12, %v244_v14 }
  0x60   : > { %v287_v49 = vrot.slane %v286_v43, 2  ;;  %v294_v51 = vrot.slane %v293_v46, 2 }
  0x61   : > { %v248_v17 = vcombine.low %v238_v13, %v245_v16 }
  0x62   : > { %v288_v52 = vadd.f32 %v287_v49, %v286_v43  ;;  %v295_v53 = vadd.f32 %v294_v51, %v293_v46 }
  0x63   : > { %v250_v19 = vsub.f32 %v226_v0, %v248_v17 }
  0x64   : > { %v289_v54 = vrot.slane %v288_v52, 1  ;;  %v296_v55 = vrot.slane %v295_v53, 1 }
  0x65   : > { %v251_v20 = vmul.f32 1.442695, %v250_v19 }
  0x66   : > { %v290_v59 = vadd.f32 %v289_v54, %v288_v52  ;;  %v297_v62 = vadd.f32 %v296_v55, %v295_v53 }
  0x67   : > { %526 = vpow2.f32 %v251_v20 }
  0x71   : > { %v527_v27 = vpop.eup %526 }
  0x72   : > { %v254_v28 = vcombine.high %v527_v27, %v527_v27  ;;  %v256_v29 = vsel %vm231_vm0, %v527_v27, 0.0 }
  0x73   : > { %v257_v31 = vrot.slane %v256_v29, 4 }
  0x74   : > { %v263_v33 = vsel %vm231_vm0, %v254_v28, 0.0 }
  0x75   : > { %v258_v34 = vadd.f32 %v257_v31, %v256_v29  ;;  %v264_v35 = vrot.slane %v263_v33, 4 }
  0x77   : > { %v259_v38 = vrot.slane %v258_v34, 2  ;;  %v265_v39 = vadd.f32 %v264_v35, %v263_v33 }
  0x79   : > { %v260_v41 = vadd.f32 %v259_v38, %v258_v34  ;;  %v266_v42 = vrot.slane %v265_v39, 2 }
  0x7b   : > { %v261_v44 = vrot.slane %v260_v41, 1  ;;  %v267_v45 = vadd.f32 %v266_v42, %v265_v39 }
  0x7d   : > { %v262_v47 = vadd.f32 %v261_v44, %v260_v41  ;;  %v268_v48 = vrot.slane %v267_v45, 1 }
  0x7f   : > { %v269_v50 = vadd.f32 %v268_v48, %v267_v45  ;;  %528 = vlog2.f32 %v262_v47 }
  0x81   : > { %530 = vlog2.f32 %v269_v50 }
  0x89   : > { %v529_v56 = vpop.eup %528 }
  0x8a   : > { %v302_v60 = vmul.f32 0.6931472, %v529_v56 }
  0x8b   : > { %v531_v61 = vpop.eup %530 }
  0x8c   : > { %v304_v63 = vmul.f32 0.6931472, %v531_v61  ;;  %v305_v0 = vadd.f32 %v302_v60, %v238_v13 }
  0x8e   : > { %v306_v2 = vadd.f32 %v304_v63, %v245_v16  ;;  %v307_v3 = vsub.f32 %v305_v0, %v290_v59 }
  0x90   : > { %v308_v5 = vsub.f32 %v306_v2, %v297_v62  ;;  %v320_v6 = vmul.f32 %v313_v1, %v307_v3 }
  0x92   : > { %v321_v7 = vmul.f32 %v317_v4, %v308_v5  ;;  %v323_v8 = vsel %vm322_vm4, %v320_v6, 0.0 }
  0x94   : > { %v324_v9 = vsel %vm322_vm4, %v321_v7, 0.0 }
  0x95   : > { %v325_v10 = vadd.f32 %v324_v9, %v323_v8 }
  0x97   : > { %326 = vadd.xlane.f32.xlu0 %v325_v10 }
 0x124   : > { %v327_v11 = vpop.xlane.xlu0 %326 }
 0x125   : > { %v328_v12 = vrot.slane %v327_v11, 4 }
 0x127   : > { %v329_v14 = vadd.f32 %v328_v12, %v327_v11 }
 0x129   : > { %v330_v15 = vrot.slane %v329_v14, 2 }
 0x12b   : > { %v331_v17 = vadd.f32 %v330_v15, %v329_v14 }
 0x12d   : > { %v332_v13 = vrot.slane %v331_v17, 1 }
 0x12f   : > { %v333_v18 = vadd.f32 %v332_v13, %v331_v17 }
 0x131   : > { %462 = vpush %v333_v18 }
 0x162   : > { %s463_s6 = spop %462 }
 0x163   : > { %v335_v16 = vstv %s463_s6 }
 0x164   : > { %337 = vst.msk [vmem:[%s225_s4] sm:$0x1] %vm336_vm5, %v335_v16 }
 0x165 PF: > { %s18_s14 = sadd.s32 1, %s646_s14   ;;  %s850_s9 = smov %s630_s10 }
 0x166   : > { %p15_p9 = scmp.ge.s32.totalorder %s18_s14, 4   ;;  %s851_s10 = smov %s634_s11 }
 0x167   : > { %s852_s11 = smov %s715_s21  ;;  %s853_s12 = smov %s642_s13 }
 0x168   : > { %s854_s13 = smov %s856_s16  ;;  %17 = sbr.rel (!%p15_p9) target bundleno = 6 (0x6), region = 81 }
 0x16f   :  { %361 = vsyncpa [#allocation3], 1 }
 0x170   :  { %363 = vsyncpa [#allocation3 + $0x1], 1 }
 0x171   :  { %364 = vsyncpa [#allocation5], 1 }
 0x172   :  { %366 = vsyncpa [#allocation5 + $0x1], 1 }

</bundles_post_ra>
